<compile_context>
chip_gen: v6e
topology: v6e:2x2x1
jax: 0.10.0
libtpu: 0.0.40
codegen_flags: <defaults>
</compile_context>

<pallas_src>
import functools

import jax
import jax.numpy as jnp
from jax.experimental import pallas as pl
from jax.experimental.pallas import tpu as pltpu

LANE = 128
SUBLANE = 8


def _round_up(x, m):
    return (x + m - 1) // m * m


# --------------------------------------------------------------------------
# Kernel
# --------------------------------------------------------------------------
def input_gate_kernel(x_ref, w_ref, b_ref, o_ref):
    # One fused GEMM: (bt, K)bf16 @ (K, 2*Np)bf16 -> (bt, 2*Np), f32 MXU accum.
    z = jnp.dot(x_ref[...], w_ref[...],
                preferred_element_type=jnp.float32) + b_ref[...]
    n = o_ref.shape[-1]            # Np (multiple of 128 -> split on lane-tile edge)
    zf = z[:, :n]                  # ForgetGate.linear branch
    zt = z[:, n:]                  # InputGate.tanh branch
    # sigmoid(z) = 0.5*(tanh(0.5*z)+1): 1 EUP push instead of exp+recip (2).
    pass_through = 0.5 * (jnp.tanh(0.5 * zf) + 1.0)
    # Lane-dense (Np % 128 == 0) unmasked store.
    o_ref[...] = (pass_through * jnp.tanh(zt)).astype(o_ref.dtype)


# --------------------------------------------------------------------------
# One-time parameter preparation (hoisted out of the per-call path)
# --------------------------------------------------------------------------
def prepare_input_gate_params(wf, bf, wt, bt):
    """Fuse + pad the two gate weights/biases once, at parameter-init time.

    wf/wt: (in_size, out_size)  (already transposed vs nn.Linear's (out,in))
    bf/bt: (1, out_size)
    Returns (w_fused bf16 (K, 2*Np), b_fused f32 (1, 2*Np), out_size).
    """
    K, out_size = wf.shape
    n_pad = _round_up(out_size, LANE)          # lane-dense output width

    w_fused = jnp.zeros((K, 2 * n_pad), jnp.float32)
    w_fused = w_fused.at[:, :out_size].set(wf.astype(jnp.float32))
    w_fused = w_fused.at[:, n_pad:n_pad + out_size].set(wt.astype(jnp.float32))
    w_fused = w_fused.astype(jnp.bfloat16)

    b_fused = jnp.zeros((1, 2 * n_pad), jnp.float32)
    b_fused = b_fused.at[:, :out_size].set(bf.astype(jnp.float32))
    b_fused = b_fused.at[:, n_pad:n_pad + out_size].set(bt.astype(jnp.float32))

    return w_fused, b_fused, out_size


# --------------------------------------------------------------------------
# Forward wrapper
# --------------------------------------------------------------------------
def _choose_batch_tiling(batch, max_tile=512, min_tile_for_split=32):
    """Pick (tile, padded_batch).

    - tile <= max_tile (amortize per-step overhead, large DMAs on v5e/v6e)
    - grid >= 2 steps when batch is big enough (both v7x TensorCores used)
    - padding overshoot bounded by SUBLANE-1 rows per grid step
    """
    b8 = _round_up(max(batch, 1), SUBLANE)
    n_steps = pl.cdiv(b8, max_tile)
    if n_steps == 1 and b8 >= 2 * min_tile_for_split:
        n_steps = 2
    tile = _round_up(pl.cdiv(b8, n_steps), SUBLANE)
    return tile, tile * n_steps


@functools.partial(jax.jit, static_argnames=("out_size",))
def input_gate_forward(x, w_fused, b_fused, *, out_size):
    """x: (B, in_size) f32. w_fused/b_fused from prepare_input_gate_params."""
    B, K = x.shape
    two_n_pad = w_fused.shape[1]
    n_pad = two_n_pad // 2

    bt_tile, b_pad = _choose_batch_tiling(B)

    # Matmul operand in bf16; pad only when strictly needed (single jnp.pad).
    x_b = x.astype(jnp.bfloat16)
    if b_pad != B:
        x_b = jnp.pad(x_b, ((0, b_pad - B), (0, 0)))

    # VMEM guard: weights are held resident via a constant index_map.
    # TODO(synk): add a K ("arbitrary") grid axis with an f32 accumulator (or
    # an N grid axis) before in_size/out_size grow into the thousands, so the
    # resident weight block stays under v7x's 64 MiB VMEM.
    grid = (b_pad // bt_tile,)

    out = pl.pallas_call(
        input_gate_kernel,
        out_shape=jax.ShapeDtypeStruct((b_pad, n_pad), jnp.float32),
        grid_spec=pltpu.PrefetchScalarGridSpec(
            num_scalar_prefetch=0,
            grid=grid,
            in_specs=[
                # x streams / double-buffers over the batch grid axis.
                pl.BlockSpec((bt_tile, K), lambda i: (i, 0)),
                # Fused weight + bias are VMEM-resident across all batch tiles.
                pl.BlockSpec((K, two_n_pad), lambda i: (0, 0)),
                pl.BlockSpec((1, two_n_pad), lambda i: (0, 0)),
            ],
            out_specs=pl.BlockSpec((bt_tile, n_pad), lambda i: (i, 0)),
        ),
        compiler_params=pltpu.CompilerParams(
            # Batch axis has no cross-step reduction -> parallel (megacore).
            dimension_semantics=("parallel",)),
    )(x_b, w_fused, b_fused)

    # Padded rows/lanes contain sigmoid(bf)*tanh(bt) garbage -> must slice.
    return out[:B, :out_size]

# TODO(synk): at production scale, fuse all four LSTM gate GEMMs inside the
# enclosing LSTM-step kernel (fused width 4*out_size = 128 lanes at out=32:
# no lane padding, no post-slice, one pallas_call per step). This module only
# covers the two gates present in InputGate.forward().


# --------------------------------------------------------------------------
# Reference + test harness
# --------------------------------------------------------------------------
def init_linear(key, in_size, out_size, dtype=jnp.float32):
    """Deterministic stand-in for LinearLayer params (nn.Linear-style init).

    Returns W already transposed to (in_size, out_size) and bias (1, out_size),
    mirroring y = x @ W^T + b with uniform init bounded by 1/sqrt(in).
    """
    kw, kb = jax.random.split(key)
    bound = 1.0 / (in_size ** 0.5)
    w = jax.random.uniform(kw, (in_size, out_size), dtype, -bound, bound)
    b = jax.random.uniform(kb, (1, out_size), dtype, -bound, bound)
    return w, b


def reference_forward(x, wf, bf, wt, bt):
    # Same bf16 quantization of matmul operands as the kernel, f32 accumulate.
    xb = x.astype(jnp.bfloat16).astype(jnp.float32)
    wfb = wf.astype(jnp.bfloat16).astype(jnp.float32)
    wtb = wt.astype(jnp.bfloat16).astype(jnp.float32)
    pass_through = jax.nn.sigmoid(xb @ wfb + bf.astype(jnp.float32))
    inter_state = jnp.tanh(xb @ wtb + bt.astype(jnp.float32))
    return pass_through * inter_state


if __name__ == "__main__":
    key = jax.random.PRNGKey(0)
    k_x, k_f, k_t, k_unused1, k_unused2 = jax.random.split(key, 5)

    batch = 8
    in_size = 32
    forget_gate_hidden_size = 16   # declared but unused in forward()
    input_gate_hidden_size = 16    # declared but unused in forward()
    out_size = 32

    # Parameters used in forward():
    wf, bf = init_linear(k_f, in_size, out_size)   # ForgetGate.linear
    wt, bt = init_linear(k_t, in_size, out_size)   # InputGate.tanh

    # Parameters declared in __init__ but never used in forward()
    # (ForgetGate.hidden_layer / out_layer) — created for shape fidelity only.
    _ = init_linear(k_unused1, in_size, forget_gate_hidden_size)
    _ = init_linear(k_unused2, forget_gate_hidden_size, out_size)

    # One-time fusion/padding of the gate params (hoisted out of forward()).
    w_fused, b_fused, out_size_ = prepare_input_gate_params(wf, bf, wt, bt)

    x = jax.random.normal(k_x, (batch, in_size), jnp.float32)

    out = input_gate_forward(x, w_fused, b_fused, out_size=out_size_)
    out = jax.block_until_ready(out)

    ref = reference_forward(x, wf, bf, wt, bt)
    assert out.shape == (batch, out_size)
    assert jnp.allclose(out, ref, atol=1e-3, rtol=1e-3), "mismatch vs reference"

    print("KERNEL_OK")
</pallas_src>

<mosaic_0001>
module attributes {stable_mosaic.version = 11 : i64} {
  func.func @input_gate_kernel(%arg0: i32, %arg1: memref<8x32xbf16, #tpu.memory_space<vmem>>, %arg2: memref<32x256xbf16, #tpu.memory_space<vmem>>, %arg3: memref<1x256xf32, #tpu.memory_space<vmem>>, %arg4: memref<8x128xf32, #tpu.memory_space<vmem>>) attributes {dimension_semantics = [#tpu.dimension_semantics<parallel>], iteration_bounds = array<i64: 1>, scalar_prefetch = 0 : i64, scratch_operands = 0 : i64, tpu.core_type = #tpu.core_type<tc>, window_params = [{transform_indices = @transform_0, window_bounds = array<i64: 8, 32>}, {pipeline_mode = #tpu.pipeline_mode<synchronous>, transform_indices = @transform_1, window_bounds = array<i64: 32, 256>}, {pipeline_mode = #tpu.pipeline_mode<synchronous>, transform_indices = @transform_2, window_bounds = array<i64: 1, 256>}, {transform_indices = @transform_3, window_bounds = array<i64: 8, 128>}]} {
    %c0 = arith.constant 0 : index
    %c0_0 = arith.constant 0 : index
    %0 = vector.load %arg1[%c0, %c0_0] : memref<8x32xbf16, #tpu.memory_space<vmem>>, vector<8x32xbf16>
    %c0_1 = arith.constant 0 : index
    %c0_2 = arith.constant 0 : index
    %1 = vector.load %arg2[%c0_1, %c0_2] : memref<32x256xbf16, #tpu.memory_space<vmem>>, vector<32x256xbf16>
    %cst = arith.constant dense<0.000000e+00> : vector<8x256xf32>
    %2 = tpu.matmul %0, %1, %cst {dimension_numbers = #tpu.dot_dimension_numbers<[1], [0], [0], [1], [0, 0, 1, 1], [], []>} : vector<8x32xbf16>, vector<32x256xbf16>, vector<8x256xf32> -> vector<8x256xf32>
    %c0_3 = arith.constant 0 : index
    %c0_4 = arith.constant 0 : index
    %3 = vector.load %arg3[%c0_3, %c0_4] : memref<1x256xf32, #tpu.memory_space<vmem>>, vector<1x256xf32>
    %4 = vector.broadcast %3 : vector<1x256xf32> to vector<8x256xf32>
    %5 = arith.addf %2, %4 : vector<8x256xf32>
    %6 = vector.extract_strided_slice %5 {offsets = [0, 0], sizes = [8, 128], strides = [1, 1]} : vector<8x256xf32> to vector<8x128xf32>
    %7 = vector.extract_strided_slice %5 {offsets = [0, 128], sizes = [8, 128], strides = [1, 1]} : vector<8x256xf32> to vector<8x128xf32>
    %cst_5 = arith.constant 5.000000e-01 : f32
    %8 = vector.broadcast %cst_5 : f32 to vector<8x128xf32>
    %9 = arith.mulf %8, %6 : vector<8x128xf32>
    %10 = math.tanh %9 : vector<8x128xf32>
    %cst_6 = arith.constant 1.000000e+00 : f32
    %11 = vector.broadcast %cst_6 : f32 to vector<8x128xf32>
    %12 = arith.addf %10, %11 : vector<8x128xf32>
    %cst_7 = arith.constant 5.000000e-01 : f32
    %13 = vector.broadcast %cst_7 : f32 to vector<8x128xf32>
    %14 = arith.mulf %13, %12 : vector<8x128xf32>
    %15 = math.tanh %7 : vector<8x128xf32>
    %16 = arith.mulf %14, %15 : vector<8x128xf32>
    %c0_8 = arith.constant 0 : index
    %c0_9 = arith.constant 0 : index
    %17 = vector.load %arg4[%c0_8, %c0_9] : memref<8x128xf32, #tpu.memory_space<vmem>>, vector<8x128xf32>
    tpu.vector_store %arg4[%c0_8, %c0_9], %16 {strides = array<i32>} : memref<8x128xf32, #tpu.memory_space<vmem>>, vector<8x128xf32>,
    return
  }
  func.func @transform_0(%arg0: i32) -> (i32, i32) {
    %c0_i32 = arith.constant 0 : i32
    %c0_i32_0 = arith.constant 0 : i32
    return %arg0, %c0_i32 : i32, i32
  }
  func.func @transform_1(%arg0: i32) -> (i32, i32) {
    %c0_i32 = arith.constant 0 : i32
    %c0_i32_0 = arith.constant 0 : i32
    %c0_i32_1 = arith.constant 0 : i32
    return %c0_i32, %c0_i32_0 : i32, i32
  }
  func.func @transform_2(%arg0: i32) -> (i32, i32) {
    %c0_i32 = arith.constant 0 : i32
    %c0_i32_0 = arith.constant 0 : i32
    %c0_i32_1 = arith.constant 0 : i32
    return %c0_i32, %c0_i32_0 : i32, i32
  }
  func.func @transform_3(%arg0: i32) -> (i32, i32) {
    %c0_i32 = arith.constant 0 : i32
    %c0_i32_0 = arith.constant 0 : i32
    return %arg0, %c0_i32 : i32, i32
  }
}

</mosaic_0001>

<bundles_post_ra>
// kernel: input_gate_forward.1
= control target key start
LH: loop header
LB: loop body
LE: loop exit
PB: predicated region body
PF: predicated region fallthrough
CT: control target
= control target key end

     0   :  { %8 = vsyncpa [#allocation3], 0  ;;  %s235_s0 = inlined_call_operand.vmem [shape: bf16[8,32], index: 0, kind: input, shape index: {}]   ;;  %s236_s1 = inlined_call_operand.hbm [shape: bf16[32,256], index: 1, kind: input, shape index: {}]   ;;  %s237_s2 = inlined_call_operand.vmem [shape: f32[1,256], index: 2, kind: input, shape index: {}]   ;;  %s238_s3 = inlined_call_operand.hbm [shape: f32[8,128], index: 3, kind: output, shape index: {}]  }
   0x1   :  { %9 = vsyncpa [#allocation4], 0  ;;  %s198_s12 = smov [#allocation2]  }
   0x2   :  { %s17_s13 = sshll.u32 %s198_s12, 4  ;;  %s18_s13 = int_to_ptr.vmem [resolvable:$true] %s17_s13 }
   0x3   :  { %s162_s14 = scalar_lea.vmem %s18_s13, 512  ;;  %p167_p1 = scmp.lt.s32.totalorder %s18_s13, %s18_s13 }
   0x4   :  { %p163_p0 = scmp.ne.s32.totalorder %s18_s13, %s162_s14  ;;  %p168_p2 = scmp.lt.s32.totalorder %s162_s14, %s162_s14 }
   0x6   :  { %p169_p3 = por %p168_p2, %p167_p1 }
   0x8   :  { %p170_p4 = pnand %p169_p3, %p163_p0 }
   0xa   :  { %173 = shalt.err (!%p170_p4)
}
   0xb   :  { %s199_s15 = smov 128   ;;  %s200_s16 = smov 8  }
   0xc   :  { %23 = dma.hbm_to_vmem [thread:$0]  %s236_s1, 512, %s18_s13, [#allocation3], %s199_s15, %s199_s15, %s200_s16  }
   0xd   :  { %194 = dma.done.wait [#allocation3], 512  }
   0xe   :  { %195 = vsyncadd [#allocation3], 4294966784  ;;  %v201_v0 = vmov 0   ;;  %v144_v1 = vld [vmem:[#allocation2 + $0x14] ss:$8 sps:$4 sm:$0xff]   ;;  %vm67_vm0 = vcmask 261120   ;;  %v37_v6 = vlaneseq }
   0xf   :  { %103 = vmatprep.mubr.bf16.mxu0 %v201_v0  ;;  %v146_v2 = vld [vmem:[#allocation2 + $0x10] ss:$8 sps:$4 sm:$0xff]   ;;  %83 = vmatprep.subr.bf16.mxu0 %v144_v1  ;;  %v147_v3 = vld [vmem:[#allocation2 + $0x4] ss:$8 sps:$4 sm:$0xff]   ;;  %v149_v4 = vld [vmem:[#allocation2] ss:$8 sps:$4 sm:$0xff]  }
  0x10   :  { %84 = vmatpush1.bf16.msra.mxu0 %v146_v2  ;;  %v30_v5 = vld [vmem:[%s235_s0] sm:$0xf]  ;;  %v38_v7 = vshrl.u32 %v37_v6, 7  ;;  %s202_s0 = smov [#allocation5]  }
  0x11   :  { %85 = vmatprep.subr.bf16.mxu0 %v147_v3  ;;  %v35_v9 = vld [vmem:[%s237_s2] sm:$0x3]  ;;  %s125_s22 = sshll.u32 %s202_s0, 4  ;;  %s126_s22 = int_to_ptr.vmem [resolvable:$true] %s125_s22 }
  0x12   :  { %v39_v8 = vsub.s32 0, %v38_v7  ;;  %v43_v11 = vsub.s32 1, %v38_v7  ;;  %s174_s2 = scalar_lea.vmem %s126_s22, 128  ;;  %p179_p6 = scmp.lt.s32.totalorder %s126_s22, %s126_s22 }
  0x13   :  { %p175_p5 = scmp.ne.s32.totalorder %s126_s22, %s174_s2  ;;  %p180_p7 = scmp.lt.s32.totalorder %s174_s2, %s174_s2 }
  0x14   :  { %86 = vmatpush1.bf16.msra.mxu0 %v149_v4  ;;  %v40_v10 = vrot.slane %v35_v9, %v39_v8  ;;  %v44_v14 = vrot.slane %v35_v9, %v43_v11 }
  0x15   :  { %p181_p8 = por %p180_p7, %p179_p6 }
  0x17   :  { %138 = vmatmul.mubr.msk.bf16.vlgmr.msra.gmra.mxu0 %vm67_vm0, %v30_v5  ;;  %p182_p9 = pnand %p181_p8, %p175_p5 }
  0xd7   :  { %v105_v12 = vpop.f32.mrf.mxu0 }
  0xd8   :  { %v106_v13 = vadd.f32 %v105_v12, %v40_v10 }
  0xd9   :  { %v107_v15 = vpop.f32.mrf.mxu0 }
  0xda   :  { %v112_v16 = vmul.f32 0.5, %v106_v13  ;;  %v108_v18 = vadd.f32 %v107_v15, %v44_v14 }
  0xdb   :  { %v109_v17 = vpop.f32.mrf.mxu0 }
  0xdc   :  { %150 = vtanh.f32 %v112_v16 }
  0xdd   :  { %v110_v19 = vpop.f32.mrf.mxu0  ;;  %152 = vtanh.f32 %v108_v18 }
  0xe9   :  { %v151_v20 = vpop.eup %150 }
  0xea   :  { %v114_v21 = vadd.f32 1.0, %v151_v20  ;;  %v153_v23 = vpop.eup %152 }
  0xec   :  { %v115_v22 = vmul.f32 0.5, %v114_v21 }
  0xee   :  { %v117_v24 = vmul.f32 %v153_v23, %v115_v22 }
  0xf0   :  { %118 = vst [vmem:[#allocation5] sm:$0xff] %v117_v24 }
  0xf1   :  { %185 = shalt.err (!%p182_p9)
}
  0xf2   :  { %128 = dma.vmem_to_hbm [thread:$0]  %s126_s22, 128, %s238_s3, [#allocation4]  }
  0xf3   :  { %196 = dma.done.wait [#allocation4], 128  }
  0xf4   :  { %197 = vsyncadd [#allocation4], 4294967168 }
  0xf5   :  { %132 = vsyncpa [#allocation3], 1 }
  0xf6   :  { %133 = vsyncpa [#allocation4], 1 }

</bundles_post_ra>
